<compile_context>
chip_gen: v7x
topology: tpu7x:2x2x1
jax: 0.10.0
libtpu: 0.0.40
codegen_flags: <defaults>
</compile_context>

<pallas_src>
import jax
import jax.numpy as jnp
from jax.experimental import pallas as pl
from jax.experimental.pallas import tpu as pltpu

MiB = 1024 * 1024


def mapping_proxy_kernel(x_ref, mean_ref, std_ref, o_ref):
    # Affine transform + LeakyReLU(0.2), all on the VPU.
    # x block: (bt, rt, C); mean/std block: (rt, C) -> broadcasts over bt.
    y = std_ref[...] * x_ref[...] + mean_ref[...]
    # maximum(y, 0.2*y) == LeakyReLU_{0.2}(y) since slope 0.2 < 1.
    o_ref[...] = jnp.maximum(y, 0.2 * y).astype(o_ref.dtype)


def _generation_params():
    """(vmem_limit_bytes, per_block_cap_bytes, min_grid_steps) per TPU gen."""
    kind = ""
    try:
        kind = jax.devices()[0].device_kind.lower()
    except Exception:
        pass
    try:
        vmem_cap = int(pltpu.get_tpu_info().vmem_capacity_bytes)
    except Exception:
        vmem_cap = 64 * MiB  # safe lower bound across v5e / v6e / v7x
    if "v7" in kind:
        # 64 MiB physical VMEM, ~3.2 TB/s HBM, 2 TensorCores per chip.
        return max(16 * MiB, min(44 * MiB, vmem_cap - 16 * MiB)), 8 * MiB, 2
    if "v6" in kind:
        # 128 MiB physical VMEM, ~1.4 TB/s HBM.
        return max(16 * MiB, min(48 * MiB, vmem_cap - 16 * MiB)), 4 * MiB, 1
    if "v5" in kind:
        # ~0.8 TB/s HBM: 2 MiB blocks already sit near the roofline.
        return max(16 * MiB, min(32 * MiB, vmem_cap - 16 * MiB)), 2 * MiB, 1
    # Unknown generation: stay conservative.
    return min(32 * MiB, max(8 * MiB, vmem_cap // 2)), 2 * MiB, 1


def _largest_divisor_leq(n, cap):
    cap = max(1, min(cap, n))
    for d in range(cap, 0, -1):
        if n % d == 0:
            return d
    return 1


def _choose_layout(N, D):
    """Pick a lane-dense per-sample (R, C) view; C is always a multiple of 128.

    Returns (R, C, Dp): Dp >= D is the (possibly padded) last dim the inputs
    must be padded to before reshaping to (..., R, C).
    """
    if D % 128 == 0:
        return N, D, D
    flat = N * D
    if flat % 128 == 0 and (flat // 128) % 8 == 0:
        # Sublane-aligned flattened slab, no padding/copy needed.
        return flat // 128, 128, D
    # Fallback: pad the last dim up to lane width (sliced off in the wrapper).
    dp = ((D + 127) // 128) * 128
    return N, dp, dp


def mapping_proxy(x, mean, std):
    """x: (B, N, D); mean, std: (N, D). Returns LeakyReLU_0.2(std*x + mean)."""
    B, N, D = x.shape
    assert mean.shape == (N, D) and std.shape == (N, D)

    vmem_limit, per_block_cap, min_grid_steps = _generation_params()
    budget = vmem_limit - 2 * MiB  # headroom for compiler scratch

    R, C, Dp = _choose_layout(N, D)
    itemsize = x.dtype.itemsize

    if Dp != D:
        x = jnp.pad(x, [(0, 0), (0, 0), (0, Dp - D)])
        mean = jnp.pad(mean, [(0, 0), (0, Dp - D)])
        std = jnp.pad(std, [(0, 0), (0, Dp - D)])

    x2 = x.reshape(B, R, C)
    mean2 = mean.reshape(R, C)
    std2 = std.reshape(R, C)

    slab_bytes = R * C * itemsize  # one batch element of x (== out, == params)

    # VMEM per grid step ~= 4*bt*block (x + out, double-buffered)
    #                     + 4*block  (mean + std, double-buffered worst case).
    # Inner row split only if a single sample overflows the budget.
    if 8 * slab_bytes <= budget:
        rt, nr = R, 1
    else:
        row_bytes = C * itemsize
        rt = max(8, ((budget // 8) // row_bytes) // 8 * 8)  # multiple of 8 sublanes
        rt = min(rt, R)
        nr = pl.cdiv(R, rt)

    blk_bytes = rt * C * itemsize

    # ---- batch tile bt -----------------------------------------------------
    bt_vmem = max(1, (budget - 4 * blk_bytes) // (4 * blk_bytes))
    bt_blk = max(1, per_block_cap // blk_bytes)
    if nr >= min_grid_steps:
        bt_core = B
    else:
        # Keep >= min_grid_steps grid steps (v7x: feed both TensorCores).
        nb_needed = -(-min_grid_steps // nr)
        bt_core = max(1, B // nb_needed)
    bt = max(1, min(bt_vmem, bt_blk, bt_core, B))
    # Prefer a bt that divides B (no masked tail block) unless that would
    # shrink the block too much (e.g. large prime B).
    d = _largest_divisor_leq(B, bt)
    bt = d if 2 * d >= bt else bt
    nb = pl.cdiv(B, bt)

    # ---- mean/std specs: resident (constant block index when nr == 1) ------
    def param_index(b, r):
        return (r, 0)

    param_specs = [pl.BlockSpec((rt, C), param_index) for _ in range(2)]
    if nr == 1 and blk_bytes >= 512 * 1024:
        # Single-buffer the resident parameters to free VMEM for a larger bt.
        try:
            param_specs = [
                pl.BlockSpec((rt, C), param_index, pipeline_mode=pl.Buffered(1))
                for _ in range(2)
            ]
        except (TypeError, AttributeError):
            pass  # TODO(synk): drop fallback once Buffered(1) verified everywhere.

    out2 = pl.pallas_call(
        mapping_proxy_kernel,
        out_shape=jax.ShapeDtypeStruct((B, R, C), x.dtype),
        grid_spec=pltpu.PrefetchScalarGridSpec(
            num_scalar_prefetch=0,
            grid=(nb, nr),
            in_specs=[
                # bt batch elements x rt rows per grid step (long contiguous DMA).
                pl.BlockSpec((bt, rt, C), lambda b, r: (b, r, 0)),
                param_specs[0],
                param_specs[1],
            ],
            out_specs=pl.BlockSpec((bt, rt, C), lambda b, r: (b, r, 0)),
        ),
        compiler_params=pltpu.CompilerParams(
            dimension_semantics=("parallel", "parallel"),
            vmem_limit_bytes=int(vmem_limit),
        ),
    )(x2, mean2, std2)

    out = out2.reshape(B, N, Dp)
    return out[..., :D] if Dp != D else out


if __name__ == "__main__":
    key = jax.random.PRNGKey(0)

    def run_case(B, N, D):
        k_x, k_mean, k_std = jax.random.split(jax.random.fold_in(key, B * 1000 + N * D), 3)
        x = jax.random.normal(k_x, (B, N, D), dtype=jnp.float32)
        # Deterministic "gaussian fit" parameters (stand-in for gaussian_ft dict).
        mean = jax.random.normal(k_mean, (N, D), dtype=jnp.float32) * 0.1
        std = jax.nn.softplus(jax.random.normal(k_std, (N, D), dtype=jnp.float32)) + 0.5

        out = jax.block_until_ready(mapping_proxy(x, mean, std))

        # Reference check in plain JAX (same math as the PyTorch module).
        y = std[None] * x + mean[None]
        ref = jnp.where(y >= 0, y, 0.2 * y)
        assert out.shape == (B, N, D)
        assert jnp.allclose(out, ref, atol=1e-6, rtol=1e-6), (B, N, D)

    # Latent-mapping-like shapes: lane-aligned path and padded-fallback path.
    run_case(2, 8, 128)   # D % 128 == 0 -> direct lane-dense layout
    run_case(3, 5, 96)    # exercises the pad-to-128 lane-dense fallback

    print("KERNEL_OK")
</pallas_src>

<mosaic_0001>
module attributes {stable_mosaic.version = 11 : i64} {
  func.func @mapping_proxy_kernel(%arg0: i32, %arg1: i32, %arg2: memref<2x8x128xf32, #tpu.memory_space<vmem>>, %arg3: memref<8x128xf32, #tpu.memory_space<vmem>>, %arg4: memref<8x128xf32, #tpu.memory_space<vmem>>, %arg5: memref<2x8x128xf32, #tpu.memory_space<vmem>>) attributes {dimension_semantics = [#tpu.dimension_semantics<parallel>, #tpu.dimension_semantics<parallel>], iteration_bounds = array<i64: 1, 1>, scalar_prefetch = 0 : i64, scratch_operands = 0 : i64, tpu.core_type = #tpu.core_type<tc>, window_params = [{transform_indices = @transform_0, window_bounds = array<i64: 2, 8, 128>}, {transform_indices = @transform_1, window_bounds = array<i64: 8, 128>}, {transform_indices = @transform_2, window_bounds = array<i64: 8, 128>}, {transform_indices = @transform_3, window_bounds = array<i64: 2, 8, 128>}]} {
    %c0 = arith.constant 0 : index
    %c0_0 = arith.constant 0 : index
    %0 = vector.load %arg4[%c0, %c0_0] : memref<8x128xf32, #tpu.memory_space<vmem>>, vector<8x128xf32>
    %c0_1 = arith.constant 0 : index
    %c0_2 = arith.constant 0 : index
    %c0_3 = arith.constant 0 : index
    %1 = vector.load %arg2[%c0_1, %c0_2, %c0_3] : memref<2x8x128xf32, #tpu.memory_space<vmem>>, vector<2x8x128xf32>
    %2 = vector.shape_cast %0 : vector<8x128xf32> to vector<1x8x128xf32>
    %3 = vector.broadcast %2 : vector<1x8x128xf32> to vector<2x8x128xf32>
    %4 = arith.mulf %3, %1 : vector<2x8x128xf32>
    %c0_4 = arith.constant 0 : index
    %c0_5 = arith.constant 0 : index
    %5 = vector.load %arg3[%c0_4, %c0_5] : memref<8x128xf32, #tpu.memory_space<vmem>>, vector<8x128xf32>
    %6 = vector.shape_cast %5 : vector<8x128xf32> to vector<1x8x128xf32>
    %7 = vector.broadcast %6 : vector<1x8x128xf32> to vector<2x8x128xf32>
    %8 = arith.addf %4, %7 : vector<2x8x128xf32>
    %cst = arith.constant 2.000000e-01 : f32
    %9 = vector.broadcast %cst : f32 to vector<2x8x128xf32>
    %10 = arith.mulf %9, %8 : vector<2x8x128xf32>
    %11 = arith.maximumf %8, %10 : vector<2x8x128xf32>
    %c0_6 = arith.constant 0 : index
    %c0_7 = arith.constant 0 : index
    %c0_8 = arith.constant 0 : index
    %12 = vector.load %arg5[%c0_6, %c0_7, %c0_8] : memref<2x8x128xf32, #tpu.memory_space<vmem>>, vector<2x8x128xf32>
    tpu.vector_store %arg5[%c0_6, %c0_7, %c0_8], %11 {strides = array<i32>} : memref<2x8x128xf32, #tpu.memory_space<vmem>>, vector<2x8x128xf32>,
    return
  }
  func.func @transform_0(%arg0: i32, %arg1: i32) -> (i32, i32, i32) {
    %c0_i32 = arith.constant 0 : i32
    %c0_i32_0 = arith.constant 0 : i32
    return %arg0, %arg1, %c0_i32 : i32, i32, i32
  }
  func.func @transform_1(%arg0: i32, %arg1: i32) -> (i32, i32) {
    %c0_i32 = arith.constant 0 : i32
    %c0_i32_0 = arith.constant 0 : i32
    return %arg1, %c0_i32 : i32, i32
  }
  func.func @transform_2(%arg0: i32, %arg1: i32) -> (i32, i32) {
    %c0_i32 = arith.constant 0 : i32
    %c0_i32_0 = arith.constant 0 : i32
    return %arg1, %c0_i32 : i32, i32
  }
  func.func @transform_3(%arg0: i32, %arg1: i32) -> (i32, i32, i32) {
    %c0_i32 = arith.constant 0 : i32
    %c0_i32_0 = arith.constant 0 : i32
    return %arg0, %arg1, %c0_i32 : i32, i32, i32
  }
}

</mosaic_0001>

<bundles_post_ra>
// kernel: tpu_custom_call.1
= control target key start
LH: loop header
LB: loop body
LE: loop exit
PB: predicated region body
PF: predicated region fallthrough
CT: control target
= control target key end

     0   :  { %8 = vsyncpa [#allocation3], 0  ;;  %s271_s0 = inlined_call_operand.hbm [shape: f32[2,8,128], index: 0, kind: input, shape index: {}]   ;;  %s272_s1 = inlined_call_operand.hbm [shape: f32[8,128], index: 1, kind: input, shape index: {}]   ;;  %s273_s2 = inlined_call_operand.hbm [shape: f32[8,128], index: 2, kind: input, shape index: {}]   ;;  %s274_s3 = inlined_call_operand.hbm [shape: f32[2,8,128], index: 3, kind: output, shape index: {}]  }
   0x1   :  { %9 = vsyncpa [#allocation6], 0 }
   0x2   :  { %10 = vsyncpa [#allocation4], 0  ;;  %s184_s12 = smov [#allocation5]   ;;  %s185_s14 = smov [#allocation2]  }
   0x3   :  { %s29_s13 = sshll.u32 %s184_s12, 4  ;;  %s16_s15 = sshll.u32 %s185_s14, 4  ;;  %s30_s13 = int_to_ptr.vmem [resolvable:$true] %s29_s13  ;;  %s210_s15 = int_to_ptr.vmem [resolvable:$true] %s16_s15 }
   0x4   :  { %s90_s18 = scalar_lea.hbm %s272_s1, 128 }
   0x5   :  { %p91_p0 = scmp.ne.s32.totalorder %s272_s1, %s90_s18  ;;  %p94_p1 = scmp.lt.u32.totalorder %s90_s18, %s272_s1 }
   0x7   :  { %p96_p2 = pnand %p94_p1, %p91_p0 }
   0x9   :  { %99 = shalt.err (!%p96_p2)
}
   0xa   :  { %s100_s23 = scalar_lea.vmem %s30_s13, 128  ;;  %p105_p4 = scmp.lt.s32.totalorder %s30_s13, %s30_s13 }
   0xb   :  { %p101_p3 = scmp.ne.s32.totalorder %s30_s13, %s100_s23  ;;  %p106_p5 = scmp.lt.s32.totalorder %s100_s23, %s100_s23 }
   0xd   :  { %p107_p6 = por %p106_p5, %p105_p4 }
   0xf   :  { %p108_p7 = pnand %p107_p6, %p101_p3 }
  0x11   :  { %111 = shalt.err (!%p108_p7)
}
  0x12   :  { %32 = dma.hbm_to_vmem [thread:$0]  %s272_s1, 128, %s30_s13, [#allocation6]  }
  0x13   :  { %s112_s28 = scalar_lea.hbm %s271_s0, 256 }
  0x14   :  { %p113_p8 = scmp.ne.s32.totalorder %s271_s0, %s112_s28  ;;  %p116_p9 = scmp.lt.u32.totalorder %s112_s28, %s271_s0 }
  0x16   :  { %p118_p10 = pnand %p116_p9, %p113_p8 }
  0x18   :  { %121 = shalt.err (!%p118_p10)
}
  0x19   :  { %s122_s6 = scalar_lea.vmem %s210_s15, 256  ;;  %p127_p12 = scmp.lt.s32.totalorder %s210_s15, %s210_s15 }
  0x1a   :  { %p123_p11 = scmp.ne.s32.totalorder %s210_s15, %s122_s6  ;;  %p128_p13 = scmp.lt.s32.totalorder %s122_s6, %s122_s6 }
  0x1c   :  { %p129_p0 = por %p128_p13, %p127_p12 }
  0x1e   :  { %p130_p1 = pnand %p129_p0, %p123_p11 }
  0x20   :  { %133 = shalt.err (!%p130_p1)
}
  0x21   :  { %s186_s1 = smov 128   ;;  %s187_s7 = smov 8  }
  0x22   :  { %22 = dma.hbm_to_vmem [thread:$0]  %s271_s0, 256, %s210_s15, [#allocation3], %s186_s1, %s186_s1, %s187_s7  }
  0x23   :  { %s188_s10 = smov [#allocation7]   ;;  %s134_s14 = scalar_lea.hbm %s273_s2, 128 }
  0x24   :  { %s39_s11 = sshll.u32 %s188_s10, 4  ;;  %p135_p2 = scmp.ne.s32.totalorder %s273_s2, %s134_s14  ;;  %s40_s11 = int_to_ptr.vmem [resolvable:$true] %s39_s11 }
  0x25   :  { %p138_p3 = scmp.lt.u32.totalorder %s134_s14, %s273_s2 }
  0x27   :  { %p140_p4 = pnand %p138_p3, %p135_p2 }
  0x29   :  { %143 = shalt.err (!%p140_p4)
}
  0x2a   :  { %s144_s20 = scalar_lea.vmem %s40_s11, 128  ;;  %p149_p6 = scmp.lt.s32.totalorder %s40_s11, %s40_s11 }
  0x2b   :  { %p145_p5 = scmp.ne.s32.totalorder %s40_s11, %s144_s20  ;;  %p150_p7 = scmp.lt.s32.totalorder %s144_s20, %s144_s20 }
  0x2d   :  { %p151_p8 = por %p150_p7, %p149_p6 }
  0x2f   :  { %p152_p9 = pnand %p151_p8, %p145_p5 }
  0x31   :  { %155 = shalt.err (!%p152_p9)
}
  0x32   :  { %42 = dma.hbm_to_vmem [thread:$0]  %s273_s2, 128, %s40_s11, [#allocation6]  }
  0x33   :  { %178 = dma.done.wait [#allocation3], 256  }
  0x34   :  { %179 = vsyncadd [#allocation3], 4294967040 }
  0x35   :  { %180 = dma.done.wait [#allocation6], 256  }
  0x36   :  { %181 = vsyncadd [#allocation6], 4294967040  ;;  %v52_v0 = vld [vmem:[#allocation7] sm:$0xff]  ;;  %v53_v1 = vld [vmem:[#allocation2] sm:$0xff]  ;;  %s189_s21 = smov [#allocation8]  }
  0x37   :  { %v57_v2 = vld [vmem:[#allocation5] sm:$0xff]  ;;  %v55_v3 = vmul.f32 %v53_v1, %v52_v0  ;;  %v54_v4 = vld [vmem:[#allocation2 + $0x8] sm:$0xff]  ;;  %s71_s22 = sshll.u32 %s189_s21, 4  ;;  %s72_s22 = int_to_ptr.vmem [resolvable:$true] %s71_s22 }
  0x38   :  { %v56_v5 = vmul.f32 %v54_v4, %v52_v0  ;;  %s156_s2 = scalar_lea.vmem %s72_s22, 256  ;;  %p161_p11 = scmp.lt.s32.totalorder %s72_s22, %s72_s22 }
  0x39   :  { %v58_v6 = vadd.f32 %v57_v2, %v55_v3  ;;  %p157_p10 = scmp.ne.s32.totalorder %s72_s22, %s156_s2  ;;  %p162_p12 = scmp.lt.s32.totalorder %s156_s2, %s156_s2 }
  0x3a   :  { %v59_v7 = vadd.f32 %v57_v2, %v56_v5 }
  0x3b   :  { %v60_v8 = vmul.f32 0.2, %v58_v6  ;;  %p163_p13 = por %p162_p12, %p161_p11 }
  0x3c   :  { %v61_v9 = vmul.f32 0.2, %v59_v7 }
  0x3d   :  { %v62_v10 = vmax.f32 %v58_v6, %v60_v8  ;;  %p164_p0 = pnand %p163_p13, %p157_p10 }
  0x3e   :  { %v63_v11 = vmax.f32 %v59_v7, %v61_v9 }
  0x3f   :  { %64 = vst [vmem:[#allocation8] sm:$0xff] %v62_v10 }
  0x40   :  { %65 = vst [vmem:[#allocation8 + $0x8] sm:$0xff] %v63_v11 }
  0x41   :  { %167 = shalt.err (!%p164_p0)
}
  0x42   :  { %s168_s25 = scalar_lea.hbm %s274_s3, 256 }
  0x43   :  { %p169_p1 = scmp.ne.s32.totalorder %s274_s3, %s168_s25  ;;  %p172_p2 = scmp.lt.u32.totalorder %s168_s25, %s274_s3 }
  0x45   :  { %p174_p3 = pnand %p172_p2, %p169_p1 }
  0x47   :  { %177 = shalt.err (!%p174_p3)
}
  0x48   :  { %77 = dma.vmem_to_hbm [thread:$0]  %s72_s22, 256, %s274_s3, [#allocation4], %s186_s1, %s186_s1, %s187_s7  }
  0x49   :  { %182 = dma.done.wait [#allocation4], 256  }
  0x4a   :  { %183 = vsyncadd [#allocation4], 4294967040 }
  0x4b   :  { %81 = vsyncpa [#allocation3], 1 }
  0x4c   :  { %82 = vsyncpa [#allocation6], 1 }
  0x4d   :  { %83 = vsyncpa [#allocation4], 1 }

</bundles_post_ra>
